<compile_context>
chip_gen: v5e
topology: v5e:2x2
jax: 0.10.0
libtpu: 0.0.40
codegen_flags: <defaults>
</compile_context>

<pallas_src>
import functools

import jax
import jax.numpy as jnp
import numpy as np
from jax.experimental import pallas as pl
from jax.experimental.pallas import tpu as pltpu


def _round_up(x, m):
    return ((x + m - 1) // m) * m


# --------------------------------------------------------------------------
# Path A: kernel_size == 1  ->  pointwise conv is exactly a GEMM.
# --------------------------------------------------------------------------

def _matmul_kernel(x_ref, w_ref, b_ref, o_ref, acc_ref):
    k = pl.program_id(2)

    @pl.when(k == 0)
    def _():
        acc_ref[...] = jnp.zeros_like(acc_ref)

    acc_ref[...] += jnp.dot(x_ref[...], w_ref[...],
                            preferred_element_type=jnp.float32)

    @pl.when(k == pl.num_programs(2) - 1)
    def _():
        o_ref[...] = (acc_ref[...] + b_ref[...]).astype(o_ref.dtype)


def _pointwise_conv(x, weight, bias2d, *, padding, stride):
    """x: (B, T, C_in), weight: (1, C_in, C_out) -> (B, T_out, C_out)."""
    B, T, C_in = x.shape
    _, _, C_out = weight.shape
    t_out = (T + 2 * padding - 1) // stride + 1

    # K == 1: padding only adds bias-valued rows; stride is a row sub-sample.
    if padding:
        x = jnp.pad(x, ((0, 0), (padding, padding), (0, 0)))
    if stride != 1:
        x = x[:, ::stride, :]
    x = x[:, :t_out, :]

    M = B * t_out
    C_in_p = _round_up(C_in, 128)
    C_out_p = _round_up(C_out, 128)

    # MXU-shaped, lane-dense tiles.
    tm = min(256, _round_up(M, 8))
    tn = 256 if C_out_p % 256 == 0 else 128
    tk = 256 if C_in_p % 256 == 0 else 128
    M_p = _round_up(M, tm)

    x2d = jnp.pad(x.reshape(M, C_in), ((0, M_p - M), (0, C_in_p - C_in)))
    w2d = jnp.pad(weight[0], ((0, C_in_p - C_in), (0, C_out_p - C_out)))
    b2d = jnp.pad(bias2d, ((0, 0), (0, C_out_p - C_out)))

    out = pl.pallas_call(
        _matmul_kernel,
        out_shape=jax.ShapeDtypeStruct((M_p, C_out_p), x.dtype),
        grid_spec=pltpu.PrefetchScalarGridSpec(
            num_scalar_prefetch=0,
            grid=(M_p // tm, C_out_p // tn, C_in_p // tk),
            in_specs=[
                pl.BlockSpec((tm, tk), lambda i, j, k: (i, k)),
                pl.BlockSpec((tk, tn), lambda i, j, k: (k, j)),
                pl.BlockSpec((1, tn), lambda i, j, k: (0, j)),
            ],
            out_specs=pl.BlockSpec((tm, tn), lambda i, j, k: (i, j)),
            scratch_shapes=[pltpu.VMEM((tm, tn), jnp.float32)],
        ),
        compiler_params=pltpu.CompilerParams(
            dimension_semantics=("parallel", "parallel", "arbitrary"),
            vmem_limit_bytes=48 * 1024 * 1024,  # headroom, fits v7x 64 MiB VMEM
        ),
    )(x2d, w2d, b2d)

    return out[:M, :C_out].reshape(B, t_out, C_out)


# --------------------------------------------------------------------------
# Path B: kernel_size > 1, stride == 1.  Time-tiled conv with a halo fetched
# through a second (small, 8-row-aligned) BlockSpec on the same input.
# --------------------------------------------------------------------------

def _conv_kernel(x_ref, xh_ref, w_ref, b_ref, o_ref, *,
                 kernel_size, dilation, t_tile):
    """x_ref : (1, tT, C_in_p)   current time tile
       xh_ref: (1, hB, C_in_p)   halo rows (start of the next tile)
       w_ref : (K, C_in_p, cN)
       b_ref : (1, cN)
       o_ref : (1, tT, cN)
    """
    # (tT + hB, C_in_p) window covering the full receptive field of this tile.
    x_win = jnp.concatenate([x_ref[0], xh_ref[0]], axis=0)

    # Register accumulation across taps (no per-tap VMEM round-trip).
    acc = jnp.dot(x_win[0:t_tile], w_ref[0],
                  preferred_element_type=jnp.float32)
    for j in range(1, kernel_size):
        s = j * dilation
        acc = acc + jnp.dot(x_win[s:s + t_tile], w_ref[j],
                            preferred_element_type=jnp.float32)

    o_ref[0] = (acc + b_ref[...]).astype(o_ref.dtype)


def _general_conv(x, weight, bias2d, *, padding, dilation):
    B, T, C_in = x.shape
    K, _, C_out = weight.shape
    halo = (K - 1) * dilation
    t_out = T + 2 * padding - halo
    if t_out <= 0:
        raise ValueError("non-positive output length")

    C_in_p = _round_up(C_in, 128)
    C_out_p = _round_up(C_out, 128)
    cN = 256 if C_out_p % 256 == 0 else 128     # lane-dense output tile
    nC = C_out_p // cN

    # Halo block: sublane-aligned, >= halo.
    hB = _round_up(max(halo, 1), 8)
    # Time tile: ~256 rows, multiple of hB, capped so the x tile stays ~<= 2 MiB.
    bytes_per_row = C_in_p * x.dtype.itemsize
    cap = max(hB, ((2 * 1024 * 1024) // bytes_per_row) // hB * hB)
    t_target = max(hB, (256 // hB) * hB)
    tT = min(t_target, cap, _round_up(t_out, hB))
    hstep = tT // hB                             # halo block index stride

    nT = -(-t_out // tT)
    L = (nT + 1) * tT                            # padded time length (extra zero tile
                                                 # keeps every block access in-bounds)

    x_p = jnp.pad(x, ((0, 0),
                      (padding, L - T - padding),
                      (0, C_in_p - C_in)))
    w_p = jnp.pad(weight, ((0, 0), (0, C_in_p - C_in), (0, C_out_p - C_out)))
    b_p = jnp.pad(bias2d, ((0, 0), (0, C_out_p - C_out)))

    kernel = functools.partial(_conv_kernel, kernel_size=K,
                               dilation=dilation, t_tile=tT)

    # TODO(synk): the weight block has a constant index_map but is still
    # double-buffered by the pipeline; single-buffering it (pl.Buffered(1)) would
    # halve its VMEM footprint for very large C_in*C_out*K.

    out = pl.pallas_call(
        kernel,
        out_shape=jax.ShapeDtypeStruct((B, nT * tT, C_out_p), x.dtype),
        grid_spec=pltpu.PrefetchScalarGridSpec(
            num_scalar_prefetch=0,
            grid=(B, nC, nT),
            in_specs=[
                # current time tile
                pl.BlockSpec((1, tT, C_in_p), lambda b, c, t: (b, t, 0)),
                # halo: first hB rows of the next tile (always in-bounds thanks to
                # the extra zero tile appended to the time axis)
                pl.BlockSpec((1, hB, C_in_p),
                             lambda b, c, t: (b, (t + 1) * hstep, 0)),
                pl.BlockSpec((K, C_in_p, cN), lambda b, c, t: (0, 0, c)),
                pl.BlockSpec((1, cN), lambda b, c, t: (0, c)),
            ],
            out_specs=pl.BlockSpec((1, tT, cN), lambda b, c, t: (b, t, c)),
        ),
        compiler_params=pltpu.CompilerParams(
            dimension_semantics=("parallel", "parallel", "parallel"),
            vmem_limit_bytes=48 * 1024 * 1024,
        ),
    )(x_p, x_p, w_p, b_p)

    return out[:, :t_out, :C_out]


# --------------------------------------------------------------------------
# Dispatcher + module mirror
# --------------------------------------------------------------------------

def conv1d_pallas(x, weight, bias, *, padding=0, dilation=1, stride=1):
    """Channels-last conv1d matching torch.nn.Conv1d (after the transposes).

    x: (B, T, C_in); weight: (K, C_in, C_out); bias: (C_out,)
    returns (B, T_out, C_out)
    """
    K = weight.shape[0]
    bias2d = bias.reshape(1, -1)
    if K == 1:
        # Pointwise conv == GEMM (handles stride/padding trivially in the wrapper).
        return _pointwise_conv(x, weight, bias2d, padding=padding, stride=stride)
    if stride != 1:
        # TODO(synk): strided K>1 conv needs strided tap slices; not implemented.
        raise NotImplementedError("stride != 1 only supported for kernel_size == 1")
    return _general_conv(x, weight, bias2d, padding=padding, dilation=dilation)


class ConvPallas:
    """Mirror of transtron.Conv (Conv1d wrapped in transposes), channels-last."""

    def __init__(self, in_channels, out_channels, kernel_size=1, stride=1,
                 padding=0, dilation=1, bias=True, key=None, dtype=jnp.float32):
        if key is None:
            key = jax.random.PRNGKey(0)
        kw, kb = jax.random.split(key)
        # Xavier-uniform init (matches the torch module's w_init intent).
        fan_in = in_channels * kernel_size
        fan_out = out_channels * kernel_size
        limit = float(np.sqrt(6.0 / (fan_in + fan_out)))
        # torch Conv1d weight is (C_out, C_in, K); stored here as (K, C_in, C_out).
        # dtype=jnp.bfloat16 halves HBM/VMEM traffic on v6e/v7x (accum stays f32).
        self.weight = jax.random.uniform(
            kw, (kernel_size, in_channels, out_channels),
            minval=-limit, maxval=limit, dtype=jnp.float32).astype(dtype)
        if bias:
            b_lim = 1.0 / np.sqrt(fan_in)
            self.bias = jax.random.uniform(
                kb, (out_channels,), minval=-b_lim, maxval=b_lim,
                dtype=jnp.float32).astype(dtype)
        else:
            self.bias = jnp.zeros((out_channels,), dtype)
        self.stride = stride
        self.padding = padding
        self.dilation = dilation

    def __call__(self, x):
        # x: (B, T, C_in) -> (B, T_out, C_out); the torch module's transposes are
        # implicit in the channels-last layout.
        if x.dtype != self.weight.dtype:
            x = x.astype(self.weight.dtype)
        return conv1d_pallas(x, self.weight, self.bias,
                             padding=self.padding, dilation=self.dilation,
                             stride=self.stride)


# --------------------------------------------------------------------------
# Pure-JAX reference (channels-last) for verification.
# --------------------------------------------------------------------------

def _reference_conv1d(x, weight, bias, padding, dilation, stride=1):
    B, T, C_in = x.shape
    K, _, C_out = weight.shape
    t_out = (T + 2 * padding - dilation * (K - 1) - 1) // stride + 1
    x_pad = jnp.pad(x, ((0, 0), (padding, padding), (0, 0)))
    acc = jnp.zeros((B, t_out, C_out), jnp.float32)
    for j in range(K):
        sl = x_pad[:, j * dilation: j * dilation + stride * (t_out - 1) + 1: stride, :]
        acc = acc + jnp.einsum("btc,cd->btd", sl, weight[j],
                               preferred_element_type=jnp.float32)
    return acc + bias[None, None, :]


if __name__ == "__main__":
    key = jax.random.PRNGKey(0)
    kx, kp1, kp2, kp3, kp4 = jax.random.split(key, 5)

    B, T, C_in, C_out = 2, 16, 32, 32
    x = jax.random.normal(kx, (B, T, C_in), dtype=jnp.float32)

    # Case 1: module defaults (kernel_size=1 -> GEMM path).
    conv1 = ConvPallas(C_in, C_out, kernel_size=1, key=kp1)
    y1 = jax.block_until_ready(conv1(x))
    ref1 = _reference_conv1d(x, conv1.weight, conv1.bias, padding=0, dilation=1)
    np.testing.assert_allclose(np.asarray(y1), np.asarray(ref1), rtol=1e-5, atol=1e-5)

    # Case 2: kernel_size=3, padding=1 (time-tiled conv path with halo).
    conv2 = ConvPallas(C_in, C_out, kernel_size=3, padding=1, key=kp2)
    y2 = jax.block_until_ready(conv2(x))
    ref2 = _reference_conv1d(x, conv2.weight, conv2.bias, padding=1, dilation=1)
    np.testing.assert_allclose(np.asarray(y2), np.asarray(ref2), rtol=1e-5, atol=1e-5)

    # Case 3: kernel_size=3, padding=2, dilation=2 (dilated taps).
    conv3 = ConvPallas(C_in, C_out, kernel_size=3, padding=2, dilation=2, key=kp3)
    y3 = jax.block_until_ready(conv3(x))
    ref3 = _reference_conv1d(x, conv3.weight, conv3.bias, padding=2, dilation=2)
    np.testing.assert_allclose(np.asarray(y3), np.asarray(ref3), rtol=1e-5, atol=1e-5)

    # Case 4: kernel_size=1, stride=2 (strided pointwise conv via GEMM path).
    conv4 = ConvPallas(C_in, C_out, kernel_size=1, stride=2, key=kp4)
    y4 = jax.block_until_ready(conv4(x))
    ref4 = _reference_conv1d(x, conv4.weight, conv4.bias, padding=0, dilation=1,
                             stride=2)
    np.testing.assert_allclose(np.asarray(y4), np.asarray(ref4), rtol=1e-5, atol=1e-5)

    print("KERNEL_OK")
</pallas_src>

<mosaic_0001>
module attributes {stable_mosaic.version = 11 : i64} {
  func.func @_matmul_kernel(%arg0: i32, %arg1: i32, %arg2: i32, %arg3: memref<32x128xf32, #tpu.memory_space<vmem>>, %arg4: memref<128x128xf32, #tpu.memory_space<vmem>>, %arg5: memref<1x128xf32, #tpu.memory_space<vmem>>, %arg6: memref<32x128xf32, #tpu.memory_space<vmem>>, %arg7: memref<32x128xf32, #tpu.memory_space<vmem>>) attributes {dimension_semantics = [#tpu.dimension_semantics<parallel>, #tpu.dimension_semantics<parallel>, #tpu.dimension_semantics<arbitrary>], iteration_bounds = array<i64: 1, 1, 1>, scalar_prefetch = 0 : i64, scratch_operands = 1 : i64, tpu.core_type = #tpu.core_type<tc>, window_params = [{transform_indices = @transform_0, window_bounds = array<i64: 32, 128>}, {transform_indices = @transform_1, window_bounds = array<i64: 128, 128>}, {transform_indices = @transform_2, window_bounds = array<i64: 1, 128>}, {transform_indices = @transform_3, window_bounds = array<i64: 32, 128>}]} {
    %c0_i32 = arith.constant 0 : i32
    %0 = arith.cmpi eq, %arg2, %c0_i32 : i32
    %1 = arith.extui %0 : i1 to i32
    %c0_i32_0 = arith.constant 0 : i32
    %2 = arith.cmpi ne, %1, %c0_i32_0 : i32
    scf.if %2 {
      %cst_10 = arith.constant 0.000000e+00 : f32
      %12 = vector.broadcast %cst_10 : f32 to vector<32x128xf32>
      %c0_11 = arith.constant 0 : index
      %c0_12 = arith.constant 0 : index
      %13 = vector.load %arg7[%c0_11, %c0_12] : memref<32x128xf32, #tpu.memory_space<vmem>>, vector<32x128xf32>
      tpu.vector_store %arg7[%c0_11, %c0_12], %12 {strides = array<i32>} : memref<32x128xf32, #tpu.memory_space<vmem>>, vector<32x128xf32>,
    } else {
    }
    %c0 = arith.constant 0 : index
    %c0_1 = arith.constant 0 : index
    %3 = vector.load %arg7[%c0, %c0_1] : memref<32x128xf32, #tpu.memory_space<vmem>>, vector<32x128xf32>
    %c0_2 = arith.constant 0 : index
    %c0_3 = arith.constant 0 : index
    %4 = vector.load %arg3[%c0_2, %c0_3] : memref<32x128xf32, #tpu.memory_space<vmem>>, vector<32x128xf32>
    %c0_4 = arith.constant 0 : index
    %c0_5 = arith.constant 0 : index
    %5 = vector.load %arg4[%c0_4, %c0_5] : memref<128x128xf32, #tpu.memory_space<vmem>>, vector<128x128xf32>
    %cst = arith.constant dense<0.000000e+00> : vector<32x128xf32>
    %6 = tpu.matmul %4, %5, %cst {dimension_numbers = #tpu.dot_dimension_numbers<[1], [0], [0], [1], [0, 0, 1, 1], [], []>} : vector<32x128xf32>, vector<128x128xf32>, vector<32x128xf32> -> vector<32x128xf32>
    %7 = arith.addf %3, %6 : vector<32x128xf32>
    %c0_6 = arith.constant 0 : index
    %c0_7 = arith.constant 0 : index
    %8 = vector.load %arg7[%c0_6, %c0_7] : memref<32x128xf32, #tpu.memory_space<vmem>>, vector<32x128xf32>
    tpu.vector_store %arg7[%c0_6, %c0_7], %7 {strides = array<i32>} : memref<32x128xf32, #tpu.memory_space<vmem>>, vector<32x128xf32>,
    %c0_i32_8 = arith.constant 0 : i32
    %9 = arith.cmpi eq, %arg2, %c0_i32_8 : i32
    %10 = arith.extui %9 : i1 to i32
    %c0_i32_9 = arith.constant 0 : i32
    %11 = arith.cmpi ne, %10, %c0_i32_9 : i32
    scf.if %11 {
      %c0_10 = arith.constant 0 : index
      %c0_11 = arith.constant 0 : index
      %12 = vector.load %arg7[%c0_10, %c0_11] : memref<32x128xf32, #tpu.memory_space<vmem>>, vector<32x128xf32>
      %c0_12 = arith.constant 0 : index
      %c0_13 = arith.constant 0 : index
      %13 = vector.load %arg5[%c0_12, %c0_13] : memref<1x128xf32, #tpu.memory_space<vmem>>, vector<1x128xf32>
      %14 = vector.broadcast %13 : vector<1x128xf32> to vector<32x128xf32>
      %15 = arith.addf %12, %14 : vector<32x128xf32>
      %c0_14 = arith.constant 0 : index
      %c0_15 = arith.constant 0 : index
      %16 = vector.load %arg6[%c0_14, %c0_15] : memref<32x128xf32, #tpu.memory_space<vmem>>, vector<32x128xf32>
      tpu.vector_store %arg6[%c0_14, %c0_15], %15 {strides = array<i32>} : memref<32x128xf32, #tpu.memory_space<vmem>>, vector<32x128xf32>,
    } else {
    }
    return
  }
  func.func @transform_0(%arg0: i32, %arg1: i32, %arg2: i32) -> (i32, i32) {
    %c0_i32 = arith.constant 0 : i32
    return %arg0, %arg2 : i32, i32
  }
  func.func @transform_1(%arg0: i32, %arg1: i32, %arg2: i32) -> (i32, i32) {
    %c0_i32 = arith.constant 0 : i32
    return %arg2, %arg1 : i32, i32
  }
  func.func @transform_2(%arg0: i32, %arg1: i32, %arg2: i32) -> (i32, i32) {
    %c0_i32 = arith.constant 0 : i32
    %c0_i32_0 = arith.constant 0 : i32
    return %c0_i32, %arg1 : i32, i32
  }
  func.func @transform_3(%arg0: i32, %arg1: i32, %arg2: i32) -> (i32, i32) {
    %c0_i32 = arith.constant 0 : i32
    return %arg0, %arg1 : i32, i32
  }
}

</mosaic_0001>

<bundles_post_ra>
// kernel: tpu_custom_call.1
= control target key start
LH: loop header
LB: loop body
LE: loop exit
PB: predicated region body
PF: predicated region fallthrough
CT: control target
= control target key end

     0   :  { %8 = vsyncpa [#allocation4], 0  ;;  %s333_s0 = inlined_call_operand.hbm [shape: f32[32,128], index: 0, kind: input, shape index: {}]   ;;  %s334_s1 = inlined_call_operand.hbm [shape: f32[128,128], index: 1, kind: input, shape index: {}]   ;;  %s335_s2 = inlined_call_operand.vmem [shape: f32[1,128], index: 2, kind: input, shape index: {}]   ;;  %s336_s3 = inlined_call_operand.hbm [shape: f32[32,128], index: 3, kind: output, shape index: {}]  }
   0x1   :  { %9 = vsyncpa [#allocation7], 0 }
   0x2   :  { %10 = vsyncpa [#allocation5], 0  ;;  %s15_s14 = sshll.u32 %s333_s0, 4  ;;  %s287_s15 = smov [#allocation3]   ;;  %s16_s14 = int_to_ptr.hbm [resolvable:$true] %s15_s14 }
   0x3   :  { %s17_s16 = sshll.u32 %s287_s15, 4  ;;  %s28_s19 = sshll.u32 %s334_s1, 4  ;;  %s18_s16 = int_to_ptr.vmem [resolvable:$true] %s17_s16  ;;  %s29_s19 = int_to_ptr.hbm [resolvable:$true] %s28_s19 }
   0x4   :  { %s288_s20 = smov 128   ;;  %s289_s21 = smov 8  }
   0x5   :  { %23 = dma.hbm_to_vmem [thread:$0]  %s16_s14, 512, %s18_s16, [#allocation4], %s288_s20, %s288_s20, %s289_s21  }
   0x6   :  { %s290_s22 = smov [#allocation6]  }
   0x7   :  { %s30_s23 = sshll.u32 %s290_s22, 4  ;;  %s31_s23 = int_to_ptr.vmem [resolvable:$true] %s30_s23 }
   0x8   :  { %36 = dma.hbm_to_vmem [thread:$0]  %s29_s19, 2048, %s31_s23, [#allocation7], %s288_s20, %s288_s20, %s289_s21  }
   0x9   :  { %281 = dma.done.wait [#allocation4], 512  }
   0xa   :  { %282 = vsyncadd [#allocation4], 4294966784 }
   0xb   :  { %283 = dma.done.wait [#allocation7], 2048  }
   0xc   :  { %284 = vsyncadd [#allocation7], 4294965248  ;;  %v78_v0 = vld [vmem:[#allocation6 + $0x78] sm:$0xff]  ;;  %v77_v1 = vld [vmem:[#allocation6 + $0x70] sm:$0xff]  ;;  %s291_s24 = smov [#allocation8]   ;;  %s141_s28 = sshll.u32 %s336_s3, 4  ;;  %s142_s28 = int_to_ptr.hbm [resolvable:$true] %s141_s28 }
   0xd   :  { %156 = vmatpush.msra.mxu2 %v78_v0  ;;  %157 = vmatpush.msra.mxu3 %v78_v0  ;;  %v76_v2 = vld [vmem:[#allocation6 + $0x68] sm:$0xff]  ;;  %v75_v3 = vld [vmem:[#allocation6 + $0x60] sm:$0xff]  ;;  %v74_v4 = vld [vmem:[#allocation6 + $0x58] sm:$0xff]  ;;  %s139_s25 = sshll.u32 %s291_s24, 4  ;;  %s140_s25 = int_to_ptr.vmem [resolvable:$true] %s139_s25 }
   0xe   :  { %79 = vmatpush.msra.mxu0 %v78_v0  ;;  %155 = vmatpush.msra.mxu1 %v78_v0  ;;  %v73_v5 = vld [vmem:[#allocation6 + $0x50] sm:$0xff]  ;;  %v72_v6 = vld [vmem:[#allocation6 + $0x48] sm:$0xff]  ;;  %v71_v7 = vld [vmem:[#allocation6 + $0x40] sm:$0xff] }
   0xf   :  { %159 = vmatpush.msra.mxu2 %v77_v1  ;;  %160 = vmatpush.msra.mxu3 %v77_v1  ;;  %v70_v8 = vld [vmem:[#allocation6 + $0x38] sm:$0xff]  ;;  %v69_v9 = vld [vmem:[#allocation6 + $0x30] sm:$0xff]  ;;  %v68_v10 = vld [vmem:[#allocation6 + $0x28] sm:$0xff] }
  0x10   :  { %80 = vmatpush.msra.mxu0 %v77_v1  ;;  %158 = vmatpush.msra.mxu1 %v77_v1  ;;  %v67_v11 = vld [vmem:[#allocation6 + $0x20] sm:$0xff]  ;;  %v66_v12 = vld [vmem:[#allocation6 + $0x18] sm:$0xff]  ;;  %v65_v13 = vld [vmem:[#allocation6 + $0x10] sm:$0xff] }
  0x11   :  { %162 = vmatpush.msra.mxu2 %v76_v2  ;;  %163 = vmatpush.msra.mxu3 %v76_v2  ;;  %v64_v14 = vld [vmem:[#allocation6 + $0x8] sm:$0xff]  ;;  %v63_v15 = vld [vmem:[#allocation6] sm:$0xff]  ;;  %v61_v16 = vld [vmem:[#allocation3 + $0x10] sm:$0xff] }
  0x12   :  { %81 = vmatpush.msra.mxu0 %v76_v2  ;;  %161 = vmatpush.msra.mxu1 %v76_v2  ;;  %v62_v17 = vld [vmem:[#allocation3 + $0x18] sm:$0xff]  ;;  %v59_v18 = vld [vmem:[#allocation3] sm:$0xff]  ;;  %v60_v19 = vld [vmem:[#allocation3 + $0x8] sm:$0xff] }
  0x13   :  { %165 = vmatpush.msra.mxu2 %v75_v3  ;;  %166 = vmatpush.msra.mxu3 %v75_v3  ;;  %v208_v20 = vld [vmem:[%s335_s2] ss:$0 sm:$0xff] }
  0x14   :  { %82 = vmatpush.msra.mxu0 %v75_v3  ;;  %164 = vmatpush.msra.mxu1 %v75_v3 }
  0x15   :  { %168 = vmatpush.msra.mxu2 %v74_v4  ;;  %169 = vmatpush.msra.mxu3 %v74_v4 }
  0x16   :  { %83 = vmatpush.msra.mxu0 %v74_v4  ;;  %167 = vmatpush.msra.mxu1 %v74_v4 }
  0x17   :  { %171 = vmatpush.msra.mxu2 %v73_v5  ;;  %172 = vmatpush.msra.mxu3 %v73_v5 }
  0x18   :  { %84 = vmatpush.msra.mxu0 %v73_v5  ;;  %170 = vmatpush.msra.mxu1 %v73_v5 }
  0x19   :  { %174 = vmatpush.msra.mxu2 %v72_v6  ;;  %175 = vmatpush.msra.mxu3 %v72_v6 }
  0x1a   :  { %85 = vmatpush.msra.mxu0 %v72_v6  ;;  %173 = vmatpush.msra.mxu1 %v72_v6 }
  0x1b   :  { %177 = vmatpush.msra.mxu2 %v71_v7  ;;  %178 = vmatpush.msra.mxu3 %v71_v7 }
  0x1c   :  { %86 = vmatpush.msra.mxu0 %v71_v7  ;;  %176 = vmatpush.msra.mxu1 %v71_v7 }
  0x1d   :  { %180 = vmatpush.msra.mxu2 %v70_v8  ;;  %181 = vmatpush.msra.mxu3 %v70_v8 }
  0x1e   :  { %87 = vmatpush.msra.mxu0 %v70_v8  ;;  %179 = vmatpush.msra.mxu1 %v70_v8 }
  0x1f   :  { %183 = vmatpush.msra.mxu2 %v69_v9  ;;  %184 = vmatpush.msra.mxu3 %v69_v9 }
  0x20   :  { %88 = vmatpush.msra.mxu0 %v69_v9  ;;  %182 = vmatpush.msra.mxu1 %v69_v9 }
  0x21   :  { %186 = vmatpush.msra.mxu2 %v68_v10  ;;  %187 = vmatpush.msra.mxu3 %v68_v10 }
  0x22   :  { %89 = vmatpush.msra.mxu0 %v68_v10  ;;  %185 = vmatpush.msra.mxu1 %v68_v10 }
  0x23   :  { %189 = vmatpush.msra.mxu2 %v67_v11  ;;  %190 = vmatpush.msra.mxu3 %v67_v11 }
  0x24   :  { %90 = vmatpush.msra.mxu0 %v67_v11  ;;  %188 = vmatpush.msra.mxu1 %v67_v11 }
  0x25   :  { %192 = vmatpush.msra.mxu2 %v66_v12  ;;  %193 = vmatpush.msra.mxu3 %v66_v12 }
  0x26   :  { %91 = vmatpush.msra.mxu0 %v66_v12  ;;  %191 = vmatpush.msra.mxu1 %v66_v12 }
  0x27   :  { %195 = vmatpush.msra.mxu2 %v65_v13  ;;  %196 = vmatpush.msra.mxu3 %v65_v13 }
  0x28   :  { %92 = vmatpush.msra.mxu0 %v65_v13  ;;  %194 = vmatpush.msra.mxu1 %v65_v13 }
  0x29   :  { %198 = vmatpush.msra.mxu2 %v64_v14  ;;  %199 = vmatpush.msra.mxu3 %v64_v14 }
  0x2a   :  { %93 = vmatpush.msra.mxu0 %v64_v14  ;;  %197 = vmatpush.msra.mxu1 %v64_v14 }
  0x2b   :  { %201 = vmatpush.msra.mxu2 %v63_v15  ;;  %202 = vmatpush.msra.mxu3 %v63_v15 }
  0x2c   :  { %101 = vmatmul.f32.vlgmr.msra.gmra.mxu2 %v61_v16  ;;  %104 = vmatmul.f32.vlgmr.msra.gmra.mxu3 %v62_v17 }
  0x2d   :  { %94 = vmatpush.msra.mxu0 %v63_v15  ;;  %200 = vmatpush.msra.mxu1 %v63_v15 }
  0x2e   :  { %95 = vmatmul.f32.vlgmr.msra.gmra.mxu0 %v59_v18  ;;  %98 = vmatmul.f32.vlgmr.msra.gmra.mxu1 %v60_v19 }
  0xab   :  { %v96_v21 = vpop.f32.mrf.mxu0  ;;  %v99_v22 = vpop.f32.mrf.mxu1 }
  0xac   :  { %v127_v23 = vadd.f32 %v208_v20, %v96_v21  ;;  %v128_v24 = vadd.f32 %v208_v20, %v99_v22 }
  0xae   :  { %131 = vst [vmem:[#allocation8] sm:$0xff] %v127_v23 }
  0xaf   :  { %132 = vst [vmem:[#allocation8 + $0x8] sm:$0xff] %v128_v24  ;;  %v102_v25 = vpop.f32.mrf.mxu2  ;;  %v105_v26 = vpop.f32.mrf.mxu3 }
  0xb0   :  { %v129_v27 = vadd.f32 %v208_v20, %v102_v25  ;;  %v130_v28 = vadd.f32 %v208_v20, %v105_v26 }
  0xb2   :  { %133 = vst [vmem:[#allocation8 + $0x10] sm:$0xff] %v129_v27 }
  0xb3   :  { %134 = vst [vmem:[#allocation8 + $0x18] sm:$0xff] %v130_v28 }
  0xb4   :  { %147 = dma.vmem_to_hbm [thread:$0]  %s140_s25, 512, %s142_s28, [#allocation5], %s288_s20, %s288_s20, %s289_s21  }
  0xb5   :  { %285 = dma.done.wait [#allocation5], 512  }
  0xb6   :  { %286 = vsyncadd [#allocation5], 4294966784 }
  0xb7   :  { %152 = vsyncpa [#allocation4], 1 }
  0xb8   :  { %153 = vsyncpa [#allocation7], 1 }
  0xb9   :  { %154 = vsyncpa [#allocation5], 1 }

</bundles_post_ra>
